<compile_context>
chip_gen: v5e
topology: v5e:2x2
jax: 0.10.0
libtpu: 0.0.40
codegen_flags: <defaults>
</compile_context>

<pallas_src>
import functools

import jax
import jax.numpy as jnp
from jax.experimental import pallas as pl
from jax.experimental.pallas import tpu as pltpu


def _layernorm(x, gamma, beta, eps=1e-5):
    mean = jnp.mean(x, axis=-1, keepdims=True)
    var = jnp.mean((x - mean) ** 2, axis=-1, keepdims=True)
    return (x - mean) * jax.lax.rsqrt(var + eps) * gamma + beta


def _transformer_layer_kernel(x_ref,
                              ln1g_ref, ln1b_ref, wqkv_ref, wout_ref, bout_ref,
                              ln2g_ref, ln2b_ref, w1_ref, b1_ref, w2_ref, b2_ref,
                              o_ref, x_vmem, *, heads, nseq, seqlen, dim):
    """One grid step = one transformer layer applied to one batch block.

    Grid is (batch_blocks, depth).  x_ref / o_ref: (rows, D) where rows = nseq*seqlen.
    Weight refs carry a squeezed leading depth dim (streamed per layer, bf16 matmul
    weights).  x_vmem is the persistent f32 activation carried across the depth axis.
    """
    dh = dim // heads
    rows = nseq * seqlen
    l = pl.program_id(1)

    @pl.when(l == 0)
    def _():
        x_vmem[...] = x_ref[...].astype(jnp.float32)

    x = x_vmem[...]                                          # (rows, D) f32

    # ---------------- attention block: x = x + W_out(softmax(QK^T)V) + b ----------
    xn = _layernorm(x, ln1g_ref[...], ln1b_ref[...])         # PreNorm, f32
    # scale (dim**-0.5) was folded into the Q columns of w_qkv at pack time
    qkv = jnp.dot(xn.astype(jnp.bfloat16), wqkv_ref[...],
                  preferred_element_type=jnp.float32)        # (rows, 3D) f32

    proj = None
    for h in range(heads):                                   # static head loop, batched over nseq
        qh = qkv[:, h * dh:(h + 1) * dh].reshape(nseq, seqlen, dh).astype(jnp.bfloat16)
        kh = qkv[:, dim + h * dh:dim + (h + 1) * dh].reshape(nseq, seqlen, dh).astype(jnp.bfloat16)
        vh = qkv[:, 2 * dim + h * dh:2 * dim + (h + 1) * dh].reshape(nseq, seqlen, dh).astype(jnp.bfloat16)
        s = jnp.einsum('bqd,bkd->bqk', qh, kh,
                       preferred_element_type=jnp.float32)   # (nseq, N, N) f32
        s = s - jnp.max(s, axis=-1, keepdims=True)
        e = jnp.exp(s)
        p = e * pl.reciprocal(jnp.sum(e, axis=-1, keepdims=True), approx=True)
        oh = jnp.einsum('bqk,bkd->bqd', p.astype(jnp.bfloat16), vh,
                        preferred_element_type=jnp.float32)  # (nseq, N, dh) f32
        # concat_h(o_h) @ W_out == sum_h o_h @ W_out[h*dh:(h+1)*dh, :]
        # -> accumulate as a value; no narrow masked scratch stores, one lane-dense
        #    activation write per layer.
        ph = jnp.dot(oh.reshape(rows, dh).astype(jnp.bfloat16),
                     wout_ref[h * dh:(h + 1) * dh, :],
                     preferred_element_type=jnp.float32)     # (rows, D) f32
        proj = ph if proj is None else proj + ph

    x = x + proj + bout_ref[...]                             # Residual (+ out bias)

    # ---------------- feed-forward block: x = x + W2(relu(W1 x + b1)) + b2 --------
    xn = _layernorm(x, ln2g_ref[...], ln2b_ref[...])         # PreNorm, f32
    hid = jnp.dot(xn.astype(jnp.bfloat16), w1_ref[...],
                  preferred_element_type=jnp.float32) + b1_ref[...]
    hid = jnp.maximum(hid, 0.0)                              # ReLU (f32)
    y = jnp.dot(hid.astype(jnp.bfloat16), w2_ref[...],
                preferred_element_type=jnp.float32) + b2_ref[...]
    x = x + y                                                # Residual

    x_vmem[...] = x                                          # carry to next layer

    @pl.when(l == pl.num_programs(1) - 1)
    def _():
        o_ref[...] = x.astype(o_ref.dtype)


def transformer_forward(x, packed, heads, *, seqs_per_block=None):
    """x: (B, N, D) float32; packed: output of pack_transformer_params. Returns (B, N, D)."""
    B, N, D = x.shape
    depth = packed["w_qkv"].shape[0]

    if seqs_per_block is None:
        # Whole sequences per row block: aim for >=2 batch blocks (parallel axis for
        # v7x's 2 TensorCores) while keeping row blocks reasonably sized for the MXU.
        seqs_per_block = max(1, min((B + 1) // 2, max(1, 256 // N)))
    assert B % seqs_per_block == 0, "batch must divide into whole-sequence row blocks"
    nseq = seqs_per_block
    rows = nseq * N

    x2 = x.reshape(B * N, D)                                 # lane-dense row slab
    grid = (B // nseq, depth)

    def layer_spec(arr):
        nd = arr.ndim
        # leading depth dim squeezed; streamed (and pipelined) per depth grid step
        return pl.BlockSpec((None,) + arr.shape[1:],
                            lambda b, l, _nd=nd: (l,) + (0,) * (_nd - 1))

    names = ("ln1_g", "ln1_b", "w_qkv", "w_out", "b_out",
             "ln2_g", "ln2_b", "w1", "b1", "w2", "b2")
    args = (x2,) + tuple(packed[n] for n in names)

    in_specs = [pl.BlockSpec((rows, D), lambda b, l: (b, 0))]
    in_specs += [layer_spec(packed[n]) for n in names]

    kern = functools.partial(_transformer_layer_kernel, heads=heads,
                             nseq=nseq, seqlen=N, dim=D)

    out2 = pl.pallas_call(
        kern,
        out_shape=jax.ShapeDtypeStruct((B * N, D), x.dtype),
        grid=grid,
        in_specs=in_specs,
        out_specs=pl.BlockSpec((rows, D), lambda b, l: (b, 0)),
        scratch_shapes=[pltpu.VMEM((rows, D), jnp.float32)],  # persistent activation carry
        compiler_params=pltpu.CompilerParams(
            dimension_semantics=("parallel", "arbitrary"),
            vmem_limit_bytes=32 * 1024 * 1024),
    )(*args)
    return out2.reshape(B, N, D)


def init_transformer_params(key, dim, depth, heads, mlp_dim):
    """Deterministic per-layer parameter init (synthetic; not a checkpoint load)."""
    layers = []
    for _ in range(depth):
        key, *ks = jax.random.split(key, 7)
        attn_p = {
            "ln_g": jnp.ones((1, dim), jnp.float32),
            "ln_b": jnp.zeros((1, dim), jnp.float32),
            "w_qkv": 0.05 * jax.random.normal(ks[0], (dim, 3 * dim), jnp.float32),
            "w_out": 0.05 * jax.random.normal(ks[1], (dim, dim), jnp.float32),
            "b_out": 0.01 * jax.random.normal(ks[2], (1, dim), jnp.float32),
        }
        ff_p = {
            "ln_g": jnp.ones((1, dim), jnp.float32),
            "ln_b": jnp.zeros((1, dim), jnp.float32),
            "w1": 0.05 * jax.random.normal(ks[3], (dim, mlp_dim), jnp.float32),
            "b1": 0.01 * jax.random.normal(ks[4], (1, mlp_dim), jnp.float32),
            "w2": 0.05 * jax.random.normal(ks[5], (mlp_dim, dim), jnp.float32),
            "b2": jnp.zeros((1, dim), jnp.float32),
        }
        layers.append((attn_p, ff_p))
    return layers


def pack_transformer_params(params, dim):
    """Stack per-layer params along a leading depth axis (streamed per layer by the
    kernel), fold the softmax scale (dim**-0.5) into the Q columns of w_qkv, and cast
    the MXU matmul weights to bf16 (biases / LN params stay f32 for VPU work)."""
    scale = dim ** (-0.5)
    stack_a = lambda k: jnp.stack([ap[k] for ap, _ in params])
    stack_f = lambda k: jnp.stack([fp[k] for _, fp in params])
    w_qkv = stack_a("w_qkv").at[:, :, :dim].multiply(scale)
    return {
        "ln1_g": stack_a("ln_g"), "ln1_b": stack_a("ln_b"),
        "w_qkv": w_qkv.astype(jnp.bfloat16),
        "w_out": stack_a("w_out").astype(jnp.bfloat16),
        "b_out": stack_a("b_out"),
        "ln2_g": stack_f("ln_g"), "ln2_b": stack_f("ln_b"),
        "w1": stack_f("w1").astype(jnp.bfloat16), "b1": stack_f("b1"),
        "w2": stack_f("w2").astype(jnp.bfloat16), "b2": stack_f("b2"),
    }


def _reference_forward(x, params, heads):
    """Pure-jnp f32 reference (mirrors the PyTorch module) for sanity checking."""
    B, N, D = x.shape
    dh = D // heads
    scale = D ** (-0.5)

    def ln(x, g, b, eps=1e-5):
        m = jnp.mean(x, axis=-1, keepdims=True)
        v = jnp.mean((x - m) ** 2, axis=-1, keepdims=True)
        return (x - m) / jnp.sqrt(v + eps) * g + b

    for attn_p, ff_p in params:
        xn = ln(x, attn_p["ln_g"], attn_p["ln_b"])
        qkv = xn @ attn_p["w_qkv"]
        q, k, v = jnp.split(qkv, 3, axis=-1)
        q = q.reshape(B, N, heads, dh).transpose(0, 2, 1, 3)
        k = k.reshape(B, N, heads, dh).transpose(0, 2, 1, 3)
        v = v.reshape(B, N, heads, dh).transpose(0, 2, 1, 3)
        dots = jnp.einsum("bhid,bhjd->bhij", q, k) * scale
        attn = jax.nn.softmax(dots, axis=-1)
        out = jnp.einsum("bhij,bhjd->bhid", attn, v)
        out = out.transpose(0, 2, 1, 3).reshape(B, N, D)
        x = out @ attn_p["w_out"] + attn_p["b_out"] + x

        xn = ln(x, ff_p["ln_g"], ff_p["ln_b"])
        h = jnp.maximum(xn @ ff_p["w1"] + ff_p["b1"], 0.0)
        x = h @ ff_p["w2"] + ff_p["b2"] + x
    return x


if __name__ == "__main__":
    # Small, module-consistent shapes
    B, N, D = 2, 8, 32
    depth, heads, mlp_dim = 2, 4, 64

    key = jax.random.PRNGKey(0)
    kx, kp = jax.random.split(key)
    x = jax.random.normal(kx, (B, N, D), jnp.float32)
    params = init_transformer_params(kp, D, depth, heads, mlp_dim)
    packed = pack_transformer_params(params, D)

    out = transformer_forward(x, packed, heads)
    out = jax.block_until_ready(out)

    ref = _reference_forward(x, params, heads)
    assert out.shape == (B, N, D)
    # Tolerance accounts for bf16 MXU operands + the EUP approximate reciprocal in the
    # softmax denominator; all accumulation / elementwise work stays f32.
    assert jnp.allclose(out, ref, atol=3e-2, rtol=3e-2), "mismatch vs reference"

    print("KERNEL_OK")
</pallas_src>

<mosaic_0001>
module attributes {stable_mosaic.version = 11 : i64} {
  func.func @_transformer_layer_kernel(%arg0: i32, %arg1: i32, %arg2: memref<8x32xf32, #tpu.memory_space<vmem>>, %arg3: memref<1x1x32xf32, #tpu.memory_space<vmem>>, %arg4: memref<1x1x32xf32, #tpu.memory_space<vmem>>, %arg5: memref<1x32x96xbf16, #tpu.memory_space<vmem>>, %arg6: memref<1x32x32xbf16, #tpu.memory_space<vmem>>, %arg7: memref<1x1x32xf32, #tpu.memory_space<vmem>>, %arg8: memref<1x1x32xf32, #tpu.memory_space<vmem>>, %arg9: memref<1x1x32xf32, #tpu.memory_space<vmem>>, %arg10: memref<1x32x64xbf16, #tpu.memory_space<vmem>>, %arg11: memref<1x1x64xf32, #tpu.memory_space<vmem>>, %arg12: memref<1x64x32xbf16, #tpu.memory_space<vmem>>, %arg13: memref<1x1x32xf32, #tpu.memory_space<vmem>>, %arg14: memref<8x32xf32, #tpu.memory_space<vmem>>, %arg15: memref<8x32xf32, #tpu.memory_space<vmem>>) attributes {dimension_semantics = [#tpu.dimension_semantics<parallel>, #tpu.dimension_semantics<arbitrary>], iteration_bounds = array<i64: 2, 2>, scalar_prefetch = 0 : i64, scratch_operands = 1 : i64, tpu.core_type = #tpu.core_type<tc>, window_params = [{transform_indices = @transform_0, window_bounds = array<i64: 8, 32>}, {transform_indices = @transform_1, window_bounds = array<i64: 1, 1, 32>}, {transform_indices = @transform_2, window_bounds = array<i64: 1, 1, 32>}, {transform_indices = @transform_3, window_bounds = array<i64: 1, 32, 96>}, {transform_indices = @transform_4, window_bounds = array<i64: 1, 32, 32>}, {transform_indices = @transform_5, window_bounds = array<i64: 1, 1, 32>}, {transform_indices = @transform_6, window_bounds = array<i64: 1, 1, 32>}, {transform_indices = @transform_7, window_bounds = array<i64: 1, 1, 32>}, {transform_indices = @transform_8, window_bounds = array<i64: 1, 32, 64>}, {transform_indices = @transform_9, window_bounds = array<i64: 1, 1, 64>}, {transform_indices = @transform_10, window_bounds = array<i64: 1, 64, 32>}, {transform_indices = @transform_11, window_bounds = array<i64: 1, 1, 32>}, {transform_indices = @transform_12, window_bounds = array<i64: 8, 32>}]} {
    %c0_i32 = arith.constant 0 : i32
    %0 = arith.cmpi eq, %arg1, %c0_i32 : i32
    %1 = arith.extui %0 : i1 to i32
    %c0_i32_0 = arith.constant 0 : i32
    %2 = arith.cmpi ne, %1, %c0_i32_0 : i32
    scf.if %2 {
      %c0_77 = arith.constant 0 : index
      %c0_78 = arith.constant 0 : index
      %199 = vector.load %arg2[%c0_77, %c0_78] : memref<8x32xf32, #tpu.memory_space<vmem>>, vector<8x32xf32>
      %c0_79 = arith.constant 0 : index
      %c0_80 = arith.constant 0 : index
      %200 = vector.load %arg15[%c0_79, %c0_80] : memref<8x32xf32, #tpu.memory_space<vmem>>, vector<8x32xf32>
      tpu.vector_store %arg15[%c0_79, %c0_80], %199 {strides = array<i32>} : memref<8x32xf32, #tpu.memory_space<vmem>>, vector<8x32xf32>,
    } else {
    }
    %c0 = arith.constant 0 : index
    %c0_1 = arith.constant 0 : index
    %3 = vector.load %arg15[%c0, %c0_1] : memref<8x32xf32, #tpu.memory_space<vmem>>, vector<8x32xf32>
    %c0_2 = arith.constant 0 : index
    %c0_3 = arith.constant 0 : index
    %c0_4 = arith.constant 0 : index
    %4 = vector.load %arg3[%c0_2, %c0_3, %c0_4] : memref<1x1x32xf32, #tpu.memory_space<vmem>>, vector<1x1x32xf32>
    %5 = vector.shape_cast %4 : vector<1x1x32xf32> to vector<1x32xf32>
    %c0_5 = arith.constant 0 : index
    %c0_6 = arith.constant 0 : index
    %c0_7 = arith.constant 0 : index
    %6 = vector.load %arg4[%c0_5, %c0_6, %c0_7] : memref<1x1x32xf32, #tpu.memory_space<vmem>>, vector<1x1x32xf32>
    %7 = vector.shape_cast %6 : vector<1x1x32xf32> to vector<1x32xf32>
    %cst = arith.constant dense<0.000000e+00> : vector<8xf32>
    %8 = vector.multi_reduction <add>, %3, %cst [1] : vector<8x32xf32> to vector<8xf32>
    %9 = vector.shape_cast %8 : vector<8xf32> to vector<8x1xf32>
    %cst_8 = arith.constant 3.200000e+01 : f32
    %10 = vector.broadcast %cst_8 : f32 to vector<8x1xf32>
    %11 = arith.divf %9, %10 : vector<8x1xf32>
    %12 = vector.broadcast %11 : vector<8x1xf32> to vector<8x32xf32>
    %13 = arith.subf %3, %12 : vector<8x32xf32>
    %14 = arith.mulf %13, %13 : vector<8x32xf32>
    %cst_9 = arith.constant dense<0.000000e+00> : vector<8xf32>
    %15 = vector.multi_reduction <add>, %14, %cst_9 [1] : vector<8x32xf32> to vector<8xf32>
    %16 = vector.shape_cast %15 : vector<8xf32> to vector<8x1xf32>
    %cst_10 = arith.constant 3.200000e+01 : f32
    %17 = vector.broadcast %cst_10 : f32 to vector<8x1xf32>
    %18 = arith.divf %16, %17 : vector<8x1xf32>
    %19 = vector.broadcast %11 : vector<8x1xf32> to vector<8x32xf32>
    %20 = arith.subf %3, %19 : vector<8x32xf32>
    %cst_11 = arith.constant 9.99999974E-6 : f32
    %21 = vector.broadcast %cst_11 : f32 to vector<8x1xf32>
    %22 = arith.addf %18, %21 : vector<8x1xf32>
    %23 = math.rsqrt %22 : vector<8x1xf32>
    %24 = vector.broadcast %23 : vector<8x1xf32> to vector<8x32xf32>
    %25 = arith.mulf %20, %24 : vector<8x32xf32>
    %26 = vector.broadcast %5 : vector<1x32xf32> to vector<8x32xf32>
    %27 = arith.mulf %25, %26 : vector<8x32xf32>
    %28 = vector.broadcast %7 : vector<1x32xf32> to vector<8x32xf32>
    %29 = arith.addf %27, %28 : vector<8x32xf32>
    %30 = arith.truncf %29 : vector<8x32xf32> to vector<8x32xbf16>
    %c0_12 = arith.constant 0 : index
    %c0_13 = arith.constant 0 : index
    %c0_14 = arith.constant 0 : index
    %31 = vector.load %arg5[%c0_12, %c0_13, %c0_14] : memref<1x32x96xbf16, #tpu.memory_space<vmem>>, vector<1x32x96xbf16>
    %32 = vector.shape_cast %31 : vector<1x32x96xbf16> to vector<32x96xbf16>
    %cst_15 = arith.constant dense<0.000000e+00> : vector<8x96xf32>
    %33 = tpu.matmul %30, %32, %cst_15 {dimension_numbers = #tpu.dot_dimension_numbers<[1], [0], [0], [1], [0, 0, 1, 1], [], []>} : vector<8x32xbf16>, vector<32x96xbf16>, vector<8x96xf32> -> vector<8x96xf32>
    %34 = vector.extract_strided_slice %33 {offsets = [0, 0], sizes = [8, 8], strides = [1, 1]} : vector<8x96xf32> to vector<8x8xf32>
    %35 = vector.shape_cast %34 : vector<8x8xf32> to vector<1x8x8xf32>
    %36 = arith.truncf %35 : vector<1x8x8xf32> to vector<1x8x8xbf16>
    %37 = vector.extract_strided_slice %33 {offsets = [0, 32], sizes = [8, 8], strides = [1, 1]} : vector<8x96xf32> to vector<8x8xf32>
    %38 = vector.shape_cast %37 : vector<8x8xf32> to vector<1x8x8xf32>
    %39 = arith.truncf %38 : vector<1x8x8xf32> to vector<1x8x8xbf16>
    %40 = vector.extract_strided_slice %33 {offsets = [0, 64], sizes = [8, 8], strides = [1, 1]} : vector<8x96xf32> to vector<8x8xf32>
    %41 = vector.shape_cast %40 : vector<8x8xf32> to vector<1x8x8xf32>
    %42 = arith.truncf %41 : vector<1x8x8xf32> to vector<1x8x8xbf16>
    "tpu.trace_start"() <{level = 10 : i32, message = "bqd,bkd->bqk"}> : () -> ()
    %cst_16 = arith.constant dense<0.000000e+00> : vector<1x8x8xf32>
    %43 = tpu.matmul %36, %39, %cst_16 {dimension_numbers = #tpu.dot_dimension_numbers<[2], [2], [1], [1], [0, 0, 0, 1, 1, 1], [0], [0]>} : vector<1x8x8xbf16>, vector<1x8x8xbf16>, vector<1x8x8xf32> -> vector<1x8x8xf32>
    "tpu.trace_stop"() : () -> ()
    %cst_17 = arith.constant dense<0xFF800000> : vector<1x8xf32>
    %44 = vector.multi_reduction <maximumf>, %43, %cst_17 [2] : vector<1x8x8xf32> to vector<1x8xf32>
    %45 = vector.shape_cast %44 : vector<1x8xf32> to vector<1x8x1xf32>
    %46 = vector.broadcast %45 : vector<1x8x1xf32> to vector<1x8x8xf32>
    %47 = arith.subf %43, %46 : vector<1x8x8xf32>
    %48 = math.exp %47 : vector<1x8x8xf32>
    %cst_18 = arith.constant dense<0.000000e+00> : vector<1x8xf32>
    %49 = vector.multi_reduction <add>, %48, %cst_18 [2] : vector<1x8x8xf32> to vector<1x8xf32>
    %50 = vector.shape_cast %49 : vector<1x8xf32> to vector<1x8x1xf32>
    %51 = tpu.reciprocal %50 {approx = true} : vector<1x8x1xf32> -> vector<1x8x1xf32>
    %52 = vector.broadcast %51 : vector<1x8x1xf32> to vector<1x8x8xf32>
    %53 = arith.mulf %48, %52 : vector<1x8x8xf32>
    %54 = arith.truncf %53 : vector<1x8x8xf32> to vector<1x8x8xbf16>
    "tpu.trace_start"() <{level = 10 : i32, message = "bqk,bkd->bqd"}> : () -> ()
    %cst_19 = arith.constant dense<0.000000e+00> : vector<1x8x8xf32>
    %55 = tpu.matmul %54, %42, %cst_19 {dimension_numbers = #tpu.dot_dimension_numbers<[2], [1], [1], [2], [0, 0, 0, 1, 1, 2], [0], [0]>} : vector<1x8x8xbf16>, vector<1x8x8xbf16>, vector<1x8x8xf32> -> vector<1x8x8xf32>
    "tpu.trace_stop"() : () -> ()
    %56 = vector.shape_cast %55 : vector<1x8x8xf32> to vector<8x8xf32>
    %57 = arith.truncf %56 : vector<8x8xf32> to vector<8x8xbf16>
    %c0_20 = arith.constant 0 : index
    %c0_21 = arith.constant 0 : index
    %c0_22 = arith.constant 0 : index
    %58 = vector.load %arg6[%c0_20, %c0_21, %c0_22] : memref<1x32x32xbf16, #tpu.memory_space<vmem>>, vector<1x8x32xbf16>
    %59 = vector.shape_cast %58 : vector<1x8x32xbf16> to vector<8x32xbf16>
    %cst_23 = arith.constant dense<0.000000e+00> : vector<8x32xf32>
    %60 = tpu.matmul %57, %59, %cst_23 {dimension_numbers = #tpu.dot_dimension_numbers<[1], [0], [0], [1], [0, 0, 1, 1], [], []>} : vector<8x8xbf16>, vector<8x32xbf16>, vector<8x32xf32> -> vector<8x32xf32>
    %61 = vector.extract_strided_slice %33 {offsets = [0, 8], sizes = [8, 8], strides = [1, 1]} : vector<8x96xf32> to vector<8x8xf32>
    %62 = vector.shape_cast %61 : vector<8x8xf32> to vector<1x8x8xf32>
    %63 = arith.truncf %62 : vector<1x8x8xf32> to vector<1x8x8xbf16>
    %64 = vector.extract_strided_slice %33 {offsets = [0, 40], sizes = [8, 8], strides = [1, 1]} : vector<8x96xf32> to vector<8x8xf32>
    %65 = vector.shape_cast %64 : vector<8x8xf32> to vector<1x8x8xf32>
    %66 = arith.truncf %65 : vector<1x8x8xf32> to vector<1x8x8xbf16>
    %67 = vector.extract_strided_slice %33 {offsets = [0, 72], sizes = [8, 8], strides = [1, 1]} : vector<8x96xf32> to vector<8x8xf32>
    %68 = vector.shape_cast %67 : vector<8x8xf32> to vector<1x8x8xf32>
    %69 = arith.truncf %68 : vector<1x8x8xf32> to vector<1x8x8xbf16>
    "tpu.trace_start"() <{level = 10 : i32, message = "bqd,bkd->bqk"}> : () -> ()
    %cst_24 = arith.constant dense<0.000000e+00> : vector<1x8x8xf32>
    %70 = tpu.matmul %63, %66, %cst_24 {dimension_numbers = #tpu.dot_dimension_numbers<[2], [2], [1], [1], [0, 0, 0, 1, 1, 1], [0], [0]>} : vector<1x8x8xbf16>, vector<1x8x8xbf16>, vector<1x8x8xf32> -> vector<1x8x8xf32>
    "tpu.trace_stop"() : () -> ()
    %cst_25 = arith.constant dense<0xFF800000> : vector<1x8xf32>
    %71 = vector.multi_reduction <maximumf>, %70, %cst_25 [2] : vector<1x8x8xf32> to vector<1x8xf32>
    %72 = vector.shape_cast %71 : vector<1x8xf32> to vector<1x8x1xf32>
    %73 = vector.broadcast %72 : vector<1x8x1xf32> to vector<1x8x8xf32>
    %74 = arith.subf %70, %73 : vector<1x8x8xf32>
    %75 = math.exp %74 : vector<1x8x8xf32>
    %cst_26 = arith.constant dense<0.000000e+00> : vector<1x8xf32>
    %76 = vector.multi_reduction <add>, %75, %cst_26 [2] : vector<1x8x8xf32> to vector<1x8xf32>
    %77 = vector.shape_cast %76 : vector<1x8xf32> to vector<1x8x1xf32>
    %78 = tpu.reciprocal %77 {approx = true} : vector<1x8x1xf32> -> vector<1x8x1xf32>
    %79 = vector.broadcast %78 : vector<1x8x1xf32> to vector<1x8x8xf32>
    %80 = arith.mulf %75, %79 : vector<1x8x8xf32>
    %81 = arith.truncf %80 : vector<1x8x8xf32> to vector<1x8x8xbf16>
    "tpu.trace_start"() <{level = 10 : i32, message = "bqk,bkd->bqd"}> : () -> ()
    %cst_27 = arith.constant dense<0.000000e+00> : vector<1x8x8xf32>
    %82 = tpu.matmul %81, %69, %cst_27 {dimension_numbers = #tpu.dot_dimension_numbers<[2], [1], [1], [2], [0, 0, 0, 1, 1, 2], [0], [0]>} : vector<1x8x8xbf16>, vector<1x8x8xbf16>, vector<1x8x8xf32> -> vector<1x8x8xf32>
    "tpu.trace_stop"() : () -> ()
    %83 = vector.shape_cast %82 : vector<1x8x8xf32> to vector<8x8xf32>
    %84 = arith.truncf %83 : vector<8x8xf32> to vector<8x8xbf16>
    %c0_28 = arith.constant 0 : index
    %c8 = arith.constant 8 : index
    %c0_29 = arith.constant 0 : index
    %85 = vector.load %arg6[%c0_28, %c8, %c0_29] : memref<1x32x32xbf16, #tpu.memory_space<vmem>>, vector<1x8x32xbf16>
    %86 = vector.shape_cast %85 : vector<1x8x32xbf16> to vector<8x32xbf16>
    %cst_30 = arith.constant dense<0.000000e+00> : vector<8x32xf32>
    %87 = tpu.matmul %84, %86, %cst_30 {dimension_numbers = #tpu.dot_dimension_numbers<[1], [0], [0], [1], [0, 0, 1, 1], [], []>} : vector<8x8xbf16>, vector<8x32xbf16>, vector<8x32xf32> -> vector<8x32xf32>
    %88 = arith.addf %60, %87 : vector<8x32xf32>
    %89 = vector.extract_strided_slice %33 {offsets = [0, 16], sizes = [8, 8], strides = [1, 1]} : vector<8x96xf32> to vector<8x8xf32>
    %90 = vector.shape_cast %89 : vector<8x8xf32> to vector<1x8x8xf32>
    %91 = arith.truncf %90 : vector<1x8x8xf32> to vector<1x8x8xbf16>
    %92 = vector.extract_strided_slice %33 {offsets = [0, 48], sizes = [8, 8], strides = [1, 1]} : vector<8x96xf32> to vector<8x8xf32>
    %93 = vector.shape_cast %92 : vector<8x8xf32> to vector<1x8x8xf32>
    %94 = arith.truncf %93 : vector<1x8x8xf32> to vector<1x8x8xbf16>
    %95 = vector.extract_strided_slice %33 {offsets = [0, 80], sizes = [8, 8], strides = [1, 1]} : vector<8x96xf32> to vector<8x8xf32>
    %96 = vector.shape_cast %95 : vector<8x8xf32> to vector<1x8x8xf32>
    %97 = arith.truncf %96 : vector<1x8x8xf32> to vector<1x8x8xbf16>
    "tpu.trace_start"() <{level = 10 : i32, message = "bqd,bkd->bqk"}> : () -> ()
    %cst_31 = arith.constant dense<0.000000e+00> : vector<1x8x8xf32>
    %98 = tpu.matmul %91, %94, %cst_31 {dimension_numbers = #tpu.dot_dimension_numbers<[2], [2], [1], [1], [0, 0, 0, 1, 1, 1], [0], [0]>} : vector<1x8x8xbf16>, vector<1x8x8xbf16>, vector<1x8x8xf32> -> vector<1x8x8xf32>
    "tpu.trace_stop"() : () -> ()
    %cst_32 = arith.constant dense<0xFF800000> : vector<1x8xf32>
    %99 = vector.multi_reduction <maximumf>, %98, %cst_32 [2] : vector<1x8x8xf32> to vector<1x8xf32>
    %100 = vector.shape_cast %99 : vector<1x8xf32> to vector<1x8x1xf32>
    %101 = vector.broadcast %100 : vector<1x8x1xf32> to vector<1x8x8xf32>
    %102 = arith.subf %98, %101 : vector<1x8x8xf32>
    %103 = math.exp %102 : vector<1x8x8xf32>
    %cst_33 = arith.constant dense<0.000000e+00> : vector<1x8xf32>
    %104 = vector.multi_reduction <add>, %103, %cst_33 [2] : vector<1x8x8xf32> to vector<1x8xf32>
    %105 = vector.shape_cast %104 : vector<1x8xf32> to vector<1x8x1xf32>
    %106 = tpu.reciprocal %105 {approx = true} : vector<1x8x1xf32> -> vector<1x8x1xf32>
    %107 = vector.broadcast %106 : vector<1x8x1xf32> to vector<1x8x8xf32>
    %108 = arith.mulf %103, %107 : vector<1x8x8xf32>
    %109 = arith.truncf %108 : vector<1x8x8xf32> to vector<1x8x8xbf16>
    "tpu.trace_start"() <{level = 10 : i32, message = "bqk,bkd->bqd"}> : () -> ()
    %cst_34 = arith.constant dense<0.000000e+00> : vector<1x8x8xf32>
    %110 = tpu.matmul %109, %97, %cst_34 {dimension_numbers = #tpu.dot_dimension_numbers<[2], [1], [1], [2], [0, 0, 0, 1, 1, 2], [0], [0]>} : vector<1x8x8xbf16>, vector<1x8x8xbf16>, vector<1x8x8xf32> -> vector<1x8x8xf32>
    "tpu.trace_stop"() : () -> ()
    %111 = vector.shape_cast %110 : vector<1x8x8xf32> to vector<8x8xf32>
    %112 = arith.truncf %111 : vector<8x8xf32> to vector<8x8xbf16>
    %c0_35 = arith.constant 0 : index
    %c16 = arith.constant 16 : index
    %c0_36 = arith.constant 0 : index
    %113 = vector.load %arg6[%c0_35, %c16, %c0_36] : memref<1x32x32xbf16, #tpu.memory_space<vmem>>, vector<1x8x32xbf16>
    %114 = vector.shape_cast %113 : vector<1x8x32xbf16> to vector<8x32xbf16>
    %cst_37 = arith.constant dense<0.000000e+00> : vector<8x32xf32>
    %115 = tpu.matmul %112, %114, %cst_37 {dimension_numbers = #tpu.dot_dimension_numbers<[1], [0], [0], [1], [0, 0, 1, 1], [], []>} : vector<8x8xbf16>, vector<8x32xbf16>, vector<8x32xf32> -> vector<8x32xf32>
    %116 = arith.addf %88, %115 : vector<8x32xf32>
    %117 = vector.extract_strided_slice %33 {offsets = [0, 24], sizes = [8, 8], strides = [1, 1]} : vector<8x96xf32> to vector<8x8xf32>
    %118 = vector.shape_cast %117 : vector<8x8xf32> to vector<1x8x8xf32>
    %119 = arith.truncf %118 : vector<1x8x8xf32> to vector<1x8x8xbf16>
    %120 = vector.extract_strided_slice %33 {offsets = [0, 56], sizes = [8, 8], strides = [1, 1]} : vector<8x96xf32> to vector<8x8xf32>
    %121 = vector.shape_cast %120 : vector<8x8xf32> to vector<1x8x8xf32>
    %122 = arith.truncf %121 : vector<1x8x8xf32> to vector<1x8x8xbf16>
    %123 = vector.extract_strided_slice %33 {offsets = [0, 88], sizes = [8, 8], strides = [1, 1]} : vector<8x96xf32> to vector<8x8xf32>
    %124 = vector.shape_cast %123 : vector<8x8xf32> to vector<1x8x8xf32>
    %125 = arith.truncf %124 : vector<1x8x8xf32> to vector<1x8x8xbf16>
    "tpu.trace_start"() <{level = 10 : i32, message = "bqd,bkd->bqk"}> : () -> ()
    %cst_38 = arith.constant dense<0.000000e+00> : vector<1x8x8xf32>
    %126 = tpu.matmul %119, %122, %cst_38 {dimension_numbers = #tpu.dot_dimension_numbers<[2], [2], [1], [1], [0, 0, 0, 1, 1, 1], [0], [0]>} : vector<1x8x8xbf16>, vector<1x8x8xbf16>, vector<1x8x8xf32> -> vector<1x8x8xf32>
    "tpu.trace_stop"() : () -> ()
    %cst_39 = arith.constant dense<0xFF800000> : vector<1x8xf32>
    %127 = vector.multi_reduction <maximumf>, %126, %cst_39 [2] : vector<1x8x8xf32> to vector<1x8xf32>
    %128 = vector.shape_cast %127 : vector<1x8xf32> to vector<1x8x1xf32>
    %129 = vector.broadcast %128 : vector<1x8x1xf32> to vector<1x8x8xf32>
    %130 = arith.subf %126, %129 : vector<1x8x8xf32>
    %131 = math.exp %130 : vector<1x8x8xf32>
    %cst_40 = arith.constant dense<0.000000e+00> : vector<1x8xf32>
    %132 = vector.multi_reduction <add>, %131, %cst_40 [2] : vector<1x8x8xf32> to vector<1x8xf32>
    %133 = vector.shape_cast %132 : vector<1x8xf32> to vector<1x8x1xf32>
    %134 = tpu.reciprocal %133 {approx = true} : vector<1x8x1xf32> -> vector<1x8x1xf32>
    %135 = vector.broadcast %134 : vector<1x8x1xf32> to vector<1x8x8xf32>
    %136 = arith.mulf %131, %135 : vector<1x8x8xf32>
    %137 = arith.truncf %136 : vector<1x8x8xf32> to vector<1x8x8xbf16>
    "tpu.trace_start"() <{level = 10 : i32, message = "bqk,bkd->bqd"}> : () -> ()
    %cst_41 = arith.constant dense<0.000000e+00> : vector<1x8x8xf32>
    %138 = tpu.matmul %137, %125, %cst_41 {dimension_numbers = #tpu.dot_dimension_numbers<[2], [1], [1], [2], [0, 0, 0, 1, 1, 2], [0], [0]>} : vector<1x8x8xbf16>, vector<1x8x8xbf16>, vector<1x8x8xf32> -> vector<1x8x8xf32>
    "tpu.trace_stop"() : () -> ()
    %139 = vector.shape_cast %138 : vector<1x8x8xf32> to vector<8x8xf32>
    %140 = arith.truncf %139 : vector<8x8xf32> to vector<8x8xbf16>
    %c0_42 = arith.constant 0 : index
    %c24 = arith.constant 24 : index
    %c0_43 = arith.constant 0 : index
    %141 = vector.load %arg6[%c0_42, %c24, %c0_43] : memref<1x32x32xbf16, #tpu.memory_space<vmem>>, vector<1x8x32xbf16>
    %142 = vector.shape_cast %141 : vector<1x8x32xbf16> to vector<8x32xbf16>
    %cst_44 = arith.constant dense<0.000000e+00> : vector<8x32xf32>
    %143 = tpu.matmul %140, %142, %cst_44 {dimension_numbers = #tpu.dot_dimension_numbers<[1], [0], [0], [1], [0, 0, 1, 1], [], []>} : vector<8x8xbf16>, vector<8x32xbf16>, vector<8x32xf32> -> vector<8x32xf32>
    %144 = arith.addf %116, %143 : vector<8x32xf32>
    %145 = arith.addf %3, %144 : vector<8x32xf32>
    %c0_45 = arith.constant 0 : index
    %c0_46 = arith.constant 0 : index
    %c0_47 = arith.constant 0 : index
    %146 = vector.load %arg7[%c0_45, %c0_46, %c0_47] : memref<1x1x32xf32, #tpu.memory_space<vmem>>, vector<1x1x32xf32>
    %147 = vector.shape_cast %146 : vector<1x1x32xf32> to vector<1x32xf32>
    %148 = vector.broadcast %147 : vector<1x32xf32> to vector<8x32xf32>
    %149 = arith.addf %145, %148 : vector<8x32xf32>
    %c0_48 = arith.constant 0 : index
    %c0_49 = arith.constant 0 : index
    %c0_50 = arith.constant 0 : index
    %150 = vector.load %arg8[%c0_48, %c0_49, %c0_50] : memref<1x1x32xf32, #tpu.memory_space<vmem>>, vector<1x1x32xf32>
    %151 = vector.shape_cast %150 : vector<1x1x32xf32> to vector<1x32xf32>
    %c0_51 = arith.constant 0 : index
    %c0_52 = arith.constant 0 : index
    %c0_53 = arith.constant 0 : index
    %152 = vector.load %arg9[%c0_51, %c0_52, %c0_53] : memref<1x1x32xf32, #tpu.memory_space<vmem>>, vector<1x1x32xf32>
    %153 = vector.shape_cast %152 : vector<1x1x32xf32> to vector<1x32xf32>
    %cst_54 = arith.constant dense<0.000000e+00> : vector<8xf32>
    %154 = vector.multi_reduction <add>, %149, %cst_54 [1] : vector<8x32xf32> to vector<8xf32>
    %155 = vector.shape_cast %154 : vector<8xf32> to vector<8x1xf32>
    %cst_55 = arith.constant 3.200000e+01 : f32
    %156 = vector.broadcast %cst_55 : f32 to vector<8x1xf32>
    %157 = arith.divf %155, %156 : vector<8x1xf32>
    %158 = vector.broadcast %157 : vector<8x1xf32> to vector<8x32xf32>
    %159 = arith.subf %149, %158 : vector<8x32xf32>
    %160 = arith.mulf %159, %159 : vector<8x32xf32>
    %cst_56 = arith.constant dense<0.000000e+00> : vector<8xf32>
    %161 = vector.multi_reduction <add>, %160, %cst_56 [1] : vector<8x32xf32> to vector<8xf32>
    %162 = vector.shape_cast %161 : vector<8xf32> to vector<8x1xf32>
    %cst_57 = arith.constant 3.200000e+01 : f32
    %163 = vector.broadcast %cst_57 : f32 to vector<8x1xf32>
    %164 = arith.divf %162, %163 : vector<8x1xf32>
    %165 = vector.broadcast %157 : vector<8x1xf32> to vector<8x32xf32>
    %166 = arith.subf %149, %165 : vector<8x32xf32>
    %cst_58 = arith.constant 9.99999974E-6 : f32
    %167 = vector.broadcast %cst_58 : f32 to vector<8x1xf32>
    %168 = arith.addf %164, %167 : vector<8x1xf32>
    %169 = math.rsqrt %168 : vector<8x1xf32>
    %170 = vector.broadcast %169 : vector<8x1xf32> to vector<8x32xf32>
    %171 = arith.mulf %166, %170 : vector<8x32xf32>
    %172 = vector.broadcast %151 : vector<1x32xf32> to vector<8x32xf32>
    %173 = arith.mulf %171, %172 : vector<8x32xf32>
    %174 = vector.broadcast %153 : vector<1x32xf32> to vector<8x32xf32>
    %175 = arith.addf %173, %174 : vector<8x32xf32>
    %176 = arith.truncf %175 : vector<8x32xf32> to vector<8x32xbf16>
    %c0_59 = arith.constant 0 : index
    %c0_60 = arith.constant 0 : index
    %c0_61 = arith.constant 0 : index
    %177 = vector.load %arg10[%c0_59, %c0_60, %c0_61] : memref<1x32x64xbf16, #tpu.memory_space<vmem>>, vector<1x32x64xbf16>
    %178 = vector.shape_cast %177 : vector<1x32x64xbf16> to vector<32x64xbf16>
    %cst_62 = arith.constant dense<0.000000e+00> : vector<8x64xf32>
    %179 = tpu.matmul %176, %178, %cst_62 {dimension_numbers = #tpu.dot_dimension_numbers<[1], [0], [0], [1], [0, 0, 1, 1], [], []>} : vector<8x32xbf16>, vector<32x64xbf16>, vector<8x64xf32> -> vector<8x64xf32>
    %c0_63 = arith.constant 0 : index
    %c0_64 = arith.constant 0 : index
    %c0_65 = arith.constant 0 : index
    %180 = vector.load %arg11[%c0_63, %c0_64, %c0_65] : memref<1x1x64xf32, #tpu.memory_space<vmem>>, vector<1x1x64xf32>
    %181 = vector.shape_cast %180 : vector<1x1x64xf32> to vector<1x64xf32>
    %182 = vector.broadcast %181 : vector<1x64xf32> to vector<8x64xf32>
    %183 = arith.addf %179, %182 : vector<8x64xf32>
    %cst_66 = arith.constant 0.000000e+00 : f32
    %184 = vector.broadcast %cst_66 : f32 to vector<8x64xf32>
    %185 = arith.maximumf %183, %184 : vector<8x64xf32>
    %186 = arith.truncf %185 : vector<8x64xf32> to vector<8x64xbf16>
    %c0_67 = arith.constant 0 : index
    %c0_68 = arith.constant 0 : index
    %c0_69 = arith.constant 0 : index
    %187 = vector.load %arg12[%c0_67, %c0_68, %c0_69] : memref<1x64x32xbf16, #tpu.memory_space<vmem>>, vector<1x64x32xbf16>
    %188 = vector.shape_cast %187 : vector<1x64x32xbf16> to vector<64x32xbf16>
    %cst_70 = arith.constant dense<0.000000e+00> : vector<8x32xf32>
    %189 = tpu.matmul %186, %188, %cst_70 {dimension_numbers = #tpu.dot_dimension_numbers<[1], [0], [0], [1], [0, 0, 1, 1], [], []>} : vector<8x64xbf16>, vector<64x32xbf16>, vector<8x32xf32> -> vector<8x32xf32>
    %c0_71 = arith.constant 0 : index
    %c0_72 = arith.constant 0 : index
    %c0_73 = arith.constant 0 : index
    %190 = vector.load %arg13[%c0_71, %c0_72, %c0_73] : memref<1x1x32xf32, #tpu.memory_space<vmem>>, vector<1x1x32xf32>
    %191 = vector.shape_cast %190 : vector<1x1x32xf32> to vector<1x32xf32>
    %192 = vector.broadcast %191 : vector<1x32xf32> to vector<8x32xf32>
    %193 = arith.addf %189, %192 : vector<8x32xf32>
    %194 = arith.addf %149, %193 : vector<8x32xf32>
    %c0_74 = arith.constant 0 : index
    %c0_75 = arith.constant 0 : index
    %195 = vector.load %arg15[%c0_74, %c0_75] : memref<8x32xf32, #tpu.memory_space<vmem>>, vector<8x32xf32>
    tpu.vector_store %arg15[%c0_74, %c0_75], %194 {strides = array<i32>} : memref<8x32xf32, #tpu.memory_space<vmem>>, vector<8x32xf32>,
    %c1_i32 = arith.constant 1 : i32
    %196 = arith.cmpi eq, %arg1, %c1_i32 : i32
    %197 = arith.extui %196 : i1 to i32
    %c0_i32_76 = arith.constant 0 : i32
    %198 = arith.cmpi ne, %197, %c0_i32_76 : i32
    scf.if %198 {
      %c0_77 = arith.constant 0 : index
      %c0_78 = arith.constant 0 : index
      %199 = vector.load %arg14[%c0_77, %c0_78] : memref<8x32xf32, #tpu.memory_space<vmem>>, vector<8x32xf32>
      tpu.vector_store %arg14[%c0_77, %c0_78], %194 {strides = array<i32>} : memref<8x32xf32, #tpu.memory_space<vmem>>, vector<8x32xf32>,
    } else {
    }
    return
  }
  func.func @transform_0(%arg0: i32, %arg1: i32) -> (i32, i32) {
    %c0_i32 = arith.constant 0 : i32
    %c0_i32_0 = arith.constant 0 : i32
    return %arg0, %c0_i32 : i32, i32
  }
  func.func @transform_1(%arg0: i32, %arg1: i32) -> (i32, i32, i32) {
    %c0_i32 = arith.constant 0 : i32
    %c0_i32_0 = arith.constant 0 : i32
    %c0_i32_1 = arith.constant 0 : i32
    return %arg1, %c0_i32, %c0_i32_0 : i32, i32, i32
  }
  func.func @transform_2(%arg0: i32, %arg1: i32) -> (i32, i32, i32) {
    %c0_i32 = arith.constant 0 : i32
    %c0_i32_0 = arith.constant 0 : i32
    %c0_i32_1 = arith.constant 0 : i32
    return %arg1, %c0_i32, %c0_i32_0 : i32, i32, i32
  }
  func.func @transform_3(%arg0: i32, %arg1: i32) -> (i32, i32, i32) {
    %c0_i32 = arith.constant 0 : i32
    %c0_i32_0 = arith.constant 0 : i32
    %c0_i32_1 = arith.constant 0 : i32
    return %arg1, %c0_i32, %c0_i32_0 : i32, i32, i32
  }
  func.func @transform_4(%arg0: i32, %arg1: i32) -> (i32, i32, i32) {
    %c0_i32 = arith.constant 0 : i32
    %c0_i32_0 = arith.constant 0 : i32
    %c0_i32_1 = arith.constant 0 : i32
    return %arg1, %c0_i32, %c0_i32_0 : i32, i32, i32
  }
  func.func @transform_5(%arg0: i32, %arg1: i32) -> (i32, i32, i32) {
    %c0_i32 = arith.constant 0 : i32
    %c0_i32_0 = arith.constant 0 : i32
    %c0_i32_1 = arith.constant 0 : i32
    return %arg1, %c0_i32, %c0_i32_0 : i32, i32, i32
  }
  func.func @transform_6(%arg0: i32, %arg1: i32) -> (i32, i32, i32) {
    %c0_i32 = arith.constant 0 : i32
    %c0_i32_0 = arith.constant 0 : i32
    %c0_i32_1 = arith.constant 0 : i32
    return %arg1, %c0_i32, %c0_i32_0 : i32, i32, i32
  }
  func.func @transform_7(%arg0: i32, %arg1: i32) -> (i32, i32, i32) {
    %c0_i32 = arith.constant 0 : i32
    %c0_i32_0 = arith.constant 0 : i32
    %c0_i32_1 = arith.constant 0 : i32
    return %arg1, %c0_i32, %c0_i32_0 : i32, i32, i32
  }
  func.func @transform_8(%arg0: i32, %arg1: i32) -> (i32, i32, i32) {
    %c0_i32 = arith.constant 0 : i32
    %c0_i32_0 = arith.constant 0 : i32
    %c0_i32_1 = arith.constant 0 : i32
    return %arg1, %c0_i32, %c0_i32_0 : i32, i32, i32
  }
  func.func @transform_9(%arg0: i32, %arg1: i32) -> (i32, i32, i32) {
    %c0_i32 = arith.constant 0 : i32
    %c0_i32_0 = arith.constant 0 : i32
    %c0_i32_1 = arith.constant 0 : i32
    return %arg1, %c0_i32, %c0_i32_0 : i32, i32, i32
  }
  func.func @transform_10(%arg0: i32, %arg1: i32) -> (i32, i32, i32) {
    %c0_i32 = arith.constant 0 : i32
    %c0_i32_0 = arith.constant 0 : i32
    %c0_i32_1 = arith.constant 0 : i32
    return %arg1, %c0_i32, %c0_i32_0 : i32, i32, i32
  }
  func.func @transform_11(%arg0: i32, %arg1: i32) -> (i32, i32, i32) {
    %c0_i32 = arith.constant 0 : i32
    %c0_i32_0 = arith.constant 0 : i32
    %c0_i32_1 = arith.constant 0 : i32
    return %arg1, %c0_i32, %c0_i32_0 : i32, i32, i32
  }
  func.func @transform_12(%arg0: i32, %arg1: i32) -> (i32, i32) {
    %c0_i32 = arith.constant 0 : i32
    %c0_i32_0 = arith.constant 0 : i32
    return %arg0, %c0_i32 : i32, i32
  }
}

</mosaic_0001>

<bundles_post_ra>
// kernel: tpu_custom_call.1
= control target key start
LH: loop header
LB: loop body
LE: loop exit
PB: predicated region body
PF: predicated region fallthrough
CT: control target
= control target key end

     0   :  { %s2424_s0 = inlined_call_operand.hbm [shape: f32[16,32], index: 0, kind: input, shape index: {}]   ;;  %s2425_s1 = inlined_call_operand.hbm [shape: f32[2,1,32], index: 1, kind: input, shape index: {}]   ;;  %s2426_s2 = inlined_call_operand.hbm [shape: f32[2,1,32], index: 2, kind: input, shape index: {}]   ;;  %s2427_s3 = inlined_call_operand.vmem [shape: bf16[2,32,96], index: 3, kind: input, shape index: {}]   ;;  %s2428_s4 = inlined_call_operand.vmem [shape: bf16[2,32,32], index: 4, kind: input, shape index: {}]   ;;  %s2429_s5 = inlined_call_operand.vmem [shape: f32[2,1,32], index: 5, kind: input, shape index: {}]   ;;  %s2430_s6 = inlined_call_operand.vmem [shape: f32[2,1,32], index: 6, kind: input, shape index: {}]   ;;  %s2431_s7 = inlined_call_operand.hbm [shape: f32[2,1,32], index: 7, kind: input, shape index: {}]   ;;  %s2432_s8 = inlined_call_operand.vmem [shape: bf16[2,32,64], index: 8, kind: input, shape index: {}]   ;;  %s2433_s9 = inlined_call_operand.vmem [shape: f32[2,1,64], index: 9, kind: input, shape index: {}]   ;;  %s2434_s10 = inlined_call_operand.vmem [shape: bf16[2,64,32], index: 10, kind: input, shape index: {}]   ;;  %s2435_s11 = inlined_call_operand.vmem [shape: f32[2,1,32], index: 11, kind: input, shape index: {}]   ;;  %s2436_s12 = inlined_call_operand.hbm [shape: f32[16,32], index: 12, kind: output, shape index: {}]  }
   0x1   :  { %2450 = sst [smem:[#allocation30_spill]] %s2424_s0 }
   0x2   :  { %2451 = sst [smem:[#allocation31_spill]] %s2425_s1 }
   0x3   :  { %2452 = sst [smem:[#allocation32_spill]] %s2426_s2 }
   0x4   :  { %2453 = sst [smem:[#allocation33_spill]] %s2427_s3 }
   0x5   :  { %2454 = sst [smem:[#allocation34_spill]] %s2428_s4 }
   0x6   :  { %2455 = sst [smem:[#allocation35_spill]] %s2430_s6 }
   0x7   :  { %2456 = sst [smem:[#allocation36_spill]] %s2431_s7 }
   0x8   :  { %2457 = sst [smem:[#allocation37_spill]] %s2432_s8 }
   0x9   :  { %2458 = sst [smem:[#allocation38_spill]] %s2433_s9 }
   0xa   :  { %2459 = sst [smem:[#allocation39_spill]] %s2434_s10 }
   0xb   :  { %2460 = sst [smem:[#allocation40_spill]] %s2435_s11 }
   0xc   :  { %2461 = sst [smem:[#allocation41_spill]] %s2436_s12 }
   0xd   :  { %17 = vsyncpa [#allocation4], 0 }
   0xe   :  { %19 = vsyncpa [#allocation4 + $0x1], 0 }
   0xf   :  { %20 = vsyncpa [#allocation7], 0 }
  0x10   :  { %22 = vsyncpa [#allocation7 + $0x1], 0 }
  0x11   :  { %23 = vsyncpa [#allocation10], 0 }
  0x12   :  { %25 = vsyncpa [#allocation10 + $0x1], 0 }
  0x13   :  { %26 = vsyncpa [#allocation5], 0 }
  0x14   :  { %28 = vsyncpa [#allocation5 + $0x1], 0  ;;  %s2018_s21 = smov 0   ;;  %s2020_s22 = smov 0  }
  0x15   :  { %s2022_s23 = smov 0   ;;  %s2024_s24 = smov 0  }
  0x16   :  { %s2026_s25 = smov 0   ;;  %s2028_s26 = smov 0  }
  0x17   :  { %s2030_s27 = smov 0   ;;  %s2032_s28 = smov 0  }
  0x18   :  { %s2034_s29 = smov 0   ;;  %s2036_s30 = smov 0  }
  0x19   :  { %s2038_s13 = smov 0  }
  0x1a LB: > { %2462 = sst [smem:[#allocation16_spill]] %s1903_s22  ;;  %s2072_s14 = sadd.s32 4294967295, %s1939_s13   ;;  %s1939_s13 = sphi %s2038_s13, %s34_s13   ;;  %s1935_s30 = sphi %s2036_s30, %s2517_s30   ;;  %s1931_s29 = sphi %s2034_s29, %s2516_s29   ;;  %s1927_s28 = sphi %s2032_s28, %s2515_s28   ;;  %s1923_s27 = sphi %s2030_s27, %s2514_s27   ;;  %s1919_s26 = sphi %s2028_s26, %s2513_s26   ;;  %s1915_s25 = sphi %s2026_s25, %s2512_s25   ;;  %s1911_s24 = sphi %s2024_s24, %s2511_s24   ;;  %s1907_s23 = sphi %s2022_s23, %s2510_s23   ;;  %s1903_s22 = sphi %s2020_s22, %s2509_s22   ;;  %s1899_s21 = sphi %s2018_s21, %s2508_s21  }
  0x1b   : > { %2463 = sst [smem:[#allocation17_spill]] %s1907_s23  ;;  %s43_s15 = sadd.s32 1, %s1931_s29 }
  0x1c   : > { %2464 = sst [smem:[#allocation18_spill]] %s1911_s24  ;;  %p2075_p0 = scmp.ge.s32.totalorder %s43_s15, 2 }
  0x1d   : > { %2465 = sst [smem:[#allocation19_spill]] %s1915_s25  ;;  %p61_p1 = scmp.eq.s32.totalorder %s1939_s13, 0 }
  0x1e   : > { %2466 = sst [smem:[#allocation20_spill]] %s1919_s26  ;;  %p67_p2 = scmp.eq.s32.totalorder %s2072_s14, 0 }
  0x1f   : > { %2467 = sst [smem:[#allocation21_spill]] %s1927_s28  ;;  %s79_s17 = sadd.s32 1, %s1907_s23 }
  0x20   : > { %2468 = sst [smem:[#allocation22_spill]] %s1931_s29  ;;  %s2519_s15 = smov (%p2075_p0, %s43_s15), 0 }
  0x21   : > { %2469 = sst [smem:[#allocation23_spill]] %s1935_s30  ;;  %p86_p3 = scmp.ne.s32.totalorder %s1907_s23, %s1903_s22 }
  0x22   : > { %2471 = sst [smem:[#allocation24_spill]] %s2519_s15  ;;  %p92_p4 = scmp.ne.s32.totalorder %s1903_s22, %s1899_s21 }
  0x23   : > { %s76_s18 = ssub.s32 %s1931_s29, %s2519_s15  ;;  %p88_p6 = por %p86_p3, %p61_p1 }
  0x24   : > { %p77_p5 = scmp.eq.s32.totalorder %s76_s18, 0  ;;  %p2095_p7 = por %p92_p4, %p67_p2 }
  0x25   : > { %p1558_p8 = scmp.lt.s32.totalorder %s1939_s13, 4  ;;  %s421_s12 = sand.u32 1, %s1939_s13  }
  0x26   : > { %s2101_s20 = scalar_select %p77_p5, %s1907_s23, %s79_s17  }
  0x27   : > { %s2105_s21 = sand.u32 1, %s1907_s23   ;;  %s2474_s1 = sld [smem:[#allocation31_spill]] }
  0x28   : > { %2473 = sst [smem:[#allocation25_spill]] %s2101_s20  ;;  %s424_s11 = scalar_lea.vmem [#allocation6], %s2105_s21 }
  0x29   : > { %s431_s10 = sshll.u32 %s424_s11, 4  ;;  %p2114_p9 = pnand %p1558_p8, %p88_p6  ;;  %s432_s10 = int_to_ptr.vmem [resolvable:$true] %s431_s10 }
  0x2a   : > { %p1455_p10 = scmp.ge.s32.totalorder %s1939_s13, 1  ;;  %p526_p11 = scmp.lt.s32.totalorder %s1939_s13, 5 }
  0x2b   : > { %s2120_s28 = scalar_lea.sflag [#allocation7], %s421_s12  ;;  %s1450_s15 = sadd.s32 4294967294, %s1939_s13  }
  0x2c   : > { %p2125_p12 = pnand %p1455_p10, %p526_p11  ;;  %p60_p13 = scmp.ne.s32.totalorder %s1919_s26, %s1915_s25 }
  0x2d   : > { %s427_s18 = scalar_lea.hbm %s2474_s1, %s1931_s29  ;;  %s53_s1 = sadd.s32 1, %s1919_s26 }
  0x2e   : > { %s429_s17 = sshll.u32 %s427_s18, 4  ;;  %s46_s18 = sadd.s32 1, %s1935_s30  ;;  %s430_s17 = int_to_ptr.hbm [resolvable:$true] %s429_s17 }
  0x2f   : > { %1547 = dma.hbm_to_vmem [thread:$0]  (!%p2114_p9), %s430_s17, 16, %s432_s10, %s2120_s28  }
  0x30   : > { %s2521_s18 = smov (!%p2075_p0, %s46_s18), %s1935_s30  ;;  %p66_p4 = scmp.ne.s32.totalorder %s1915_s25, %s1911_s24 }
  0x31   : > { %p48_p3 = scmp.ge.s32.totalorder %s2521_s18, 2  ;;  %p2141_p5 = por %p61_p1, %p60_p13 }
  0x32   : > { %p376_p6 = scmp.eq.s32.totalorder %s2072_s14, 3  ;;  %p2150_p10 = por %p67_p2, %p66_p4 }
  0x33   : > { %s2523_s18 = smov (%p48_p3, %s2521_s18), 0  ;;  %p382_p1 = scmp.eq.s32.totalorder %s1450_s15, 3 }
  0x34   : > { %2478 = sst [smem:[#allocation26_spill]] %s2523_s18  ;;  %p2154_p0 = por %p376_p6, %p60_p13 }
  0x35   : > { %s50_s17 = ssub.s32 %s1935_s30, %s2523_s18  ;;  %s402_s23 = sand.u32 1, %s1919_s26  }
  0x36   : > { %s2480_s16 = scalar_select %p2154_p0, 1, 0 }
  0x37   : > { %p51_p11 = scmp.eq.s32.totalorder %s50_s17, 0  ;;  %p2161_p3 = por %p382_p1, %p66_p4 }
  0x38   : > { %2481 = sst [smem:[#allocation27_spill]] %s2480_s16  ;;  %s1453_s8 = sshll.u32 %s402_s23, 3 }
  0x39   : > { %s2482_s24 = scalar_select %p2161_p3, 1, 0 }
  0x3a   : > { %s2166_s9 = scalar_select %p51_p11, %s1919_s26, %s53_s1  }
  0x3b   : > { %2483 = sst [smem:[#allocation28_spill]] %s2482_s24  ;;  %s1454_s6 = sshll.u32 %s1935_s30, 3 }
  0x3c   : > { %2484 = sst [smem:[#allocation29_spill]] %s2166_s9  ;;  %s406_s15 = scalar_lea.vmem [#allocation3], %s1453_s8 }
  0x3d   : > { %s2485_s0 = sld [smem:[#allocation30_spill]]  ;;  %s414_s17 = sshll.u32 %s406_s15, 4  ;;  %s415_s17 = int_to_ptr.vmem [resolvable:$true] %s414_s17 }
  0x3e   : > { %p1542_p2 = pnand %p1558_p8, %p2141_p5  ;;  %s2486_s2 = sld [smem:[#allocation32_spill]] }
  0x3f   : > { %s441_s3 = scalar_lea.vmem [#allocation8], %s2105_s21  ;;  %s2487_s7 = sld [smem:[#allocation36_spill]] }
  0x40   : > { %s448_s4 = sshll.u32 %s441_s3, 4  ;;  %s486_s15 = scalar_lea.vmem [#allocation9], %s2105_s21  ;;  %s449_s4 = int_to_ptr.vmem [resolvable:$true] %s448_s4 }
  0x41   : > { %s484_s9 = scalar_lea.sflag [#allocation10], %s2105_s21 }
  0x43   : > { %s410_s16 = scalar_lea.hbm %s2485_s0, %s1454_s6  ;;  %s403_s6 = scalar_lea.sflag [#allocation4], %s402_s23 }
  0x44   : > { %s412_s18 = sshll.u32 %s410_s16, 4  ;;  %s444_s30 = scalar_lea.hbm %s2486_s2, %s1931_s29  ;;  %s413_s18 = int_to_ptr.hbm [resolvable:$true] %s412_s18 }
  0x45   : > { %s446_s26 = sshll.u32 %s444_s30, 4  ;;  %s489_s12 = scalar_lea.hbm %s2487_s7, %s1931_s29  ;;  %s447_s26 = int_to_ptr.hbm [resolvable:$true] %s446_s26 }
  0x46   : > { %1544 = dma.hbm_to_vmem [thread:$0]  (!%p1542_p2), %s413_s18, 128, %s415_s17, %s403_s6  }
  0x47   : > { %1550 = dma.hbm_to_vmem [thread:$0]  (!%p2114_p9), %s447_s26, 16, %s449_s4, %s2120_s28  }
  0x48   : > { %s493_s0 = sshll.u32 %s486_s15, 4  ;;  %s491_s24 = sshll.u32 %s489_s12, 4  ;;  %s494_s0 = int_to_ptr.vmem [resolvable:$true] %s493_s0  ;;  %s492_s24 = int_to_ptr.hbm [resolvable:$true] %s491_s24 }
  0x49   : > { %1553 = dma.hbm_to_vmem [thread:$0]  (!%p2114_p9), %s492_s24, 16, %s494_s0, %s484_s9  }
  0x4a   : > { %530 = sbr.rel (%p2125_p12) target bundleno = 2378 (0x94a), region = 68  ;;  %s2195_s23 = sand.u32 (!%p2125_p12), 1, %s1915_s25  }
  0x4b   : > { %s1456_s26 = sshll.u32 (!%p2125_p12), %s2195_s23, 3  ;;  %s533_s30 = scalar_lea.sflag (!%p2125_p12), [#allocation4], %s2195_s23 }
  0x4c   : > { %s536_s28 = scalar_lea.vmem (!%p2125_p12), [#allocation3], %s1456_s26 }
  0x4f   : > { %1882 = dma.done.wait (%p2150_p10), %s533_s30, 128  }
  0x50   : > { %1884 = vsyncadd (%p2150_p10), %s533_s30, 4294967168  ;;  %s542_s0 = sand.u32 1, %s2072_s14   ;;  %s2205_s24 = sand.u32 1, %s1903_s22  }
  0x51   : > { %s543_s20 = scalar_lea.sflag [#allocation7], %s542_s0 }
  0x52   : > { %1886 = dma.done.wait (%p2095_p7), %s543_s20, 32  }
  0x53   : > { %1888 = vsyncadd (%p2095_p7), %s543_s20, 4294967264  ;;  %s561_s18 = scalar_lea.sflag [#allocation10], %s2205_s24 }
  0x54   : > { %1890 = dma.done.wait (%p2095_p7), %s561_s18, 16  }
  0x55   : > { %1892 = vsyncadd (%p2095_p7), %s561_s18, 4294967280  ;;  %p649_p8 = scmp.lt.s32.totalorder %s1923_s27, 1  ;;  %s2488_s19 = sld [smem:[#allocation33_spill]] }
  0x56   : > { %s2489_s9 = sld [smem:[#allocation34_spill]]  ;;  %s2261_s20 = scalar_lea.vmem [#allocation11], %s1456_s26 }
  0x57   : > { %s2221_s14 = scalar_select %p649_p8, %s1923_s27, 1 }
  0x58   : > { %s2490_s18 = sld [smem:[#allocation35_spill]]  ;;  %p1466_p7 = scmp.ne.s32.totalorder %s1923_s27, 0 }
  0x59   : > { %s1519_s17 = sshll.u32 %s2221_s14, 4  ;;  %s2491_s2 = sld [smem:[#allocation37_spill]] }
  0x5a   : > { %s2492_s4 = sld [smem:[#allocation38_spill]]  ;;  %s1522_s8 = sshll.u32 %s2221_s14, 5 }
  0x5b   : > { %s2231_s16 = scalar_lea.vmem %s2488_s19, %s1519_s17  ;;  %s2493_s25 = sld [smem:[#allocation39_spill]] }
  0x5c   : > { %s2236_s30 = scalar_lea.vmem %s2489_s9, %s1519_s17  ;;  %s2494_s22 = sld [smem:[#allocation40_spill]] }
  0x5e   : > { %s664_s10 = scalar_lea.vmem %s2490_s18, %s2221_s14  ;;  %685 = sbr.rel (%p1466_p7) target bundleno = 101 (0x65), region = 88 }
  0x5f   : > { %s2245_s7 = scalar_lea.vmem %s2491_s2, %s1519_s17 }
  0x60   : > { %s672_s6 = scalar_lea.vmem %s2492_s4, %s2221_s14 }
  0x61   : > { %s2255_s12 = scalar_lea.vmem %s2493_s25, %s1522_s8 }
  0x62   : > { %s680_s0 = scalar_lea.vmem %s2494_s22, %s2221_s14 }
  0x63   : > { %v686_v0 = vld [vmem:[%s536_s28] sm:$0xff]  ;;  %vm687_vm0 = vcmask 261120  }
  0x64   : > { %688 = vst.msk [vmem:[#allocation2] sm:$0xff] %vm687_vm0, %v686_v0 }
  0x65 PF: > { %vm692_vm1 = vcmask 261120   ;;  %v1941_v3 = vmov 32.0   ;;  %v1524_v15 = vld [vmem:[%s2231_s16 + $0x8] sm:$0xff]  ;;  %v1523_v16 = vld [vmem:[%s2231_s16] sm:$0xff]  ;;  %s2495_s2 = scalar_lea.vmem [#allocation6], %s2205_s24  ;;  %s2496_s22 = scalar_lea.vmem [#allocation8], %s2205_s24 }
  0x66   : > { %1667 = vrcp.f32 %v1941_v3  ;;  %756 = vmatpush.bf16.msra.mxu0 %v1524_v15  ;;  %v1660_v26 = vld [vmem:[%s2495_s2] ss:$0 sm:$0xff]  ;;  %s1942_s25 = smov 88   ;;  %s1943_s29 = smov 96   ;;  %vm769_vm6 = vcmask 64512   ;;  %vm806_vm7 = vcmask 1043456  }
  0x67   : > { %v1661_v29 = vld [vmem:[%s2496_s22] ss:$0 sm:$0xff]  ;;  %s1944_s26 = smov 80   ;;  %s1945_s28 = smov 112   ;;  %vm1190_vm11 = vcmask 523264  }
  0x68   : > { %s1946_s21 = smov 64   ;;  %s1947_s11 = smov 120   ;;  %v824_v52 = vld [vmem:[%s2236_s30] sm:$0xf] }
  0x69   : > { %s1948_s17 = smov 72   ;;  %s1949_s4 = smov 104   ;;  %v906_v53 = vsel %vm806_vm7, %v824_v52, 0 }
  0x6a   : > { %757 = vmatpush.bf16.msra.mxu0 %v1523_v16  ;;  %s1950_s16 = smov 40   ;;  %s1951_s18 = smov 56  }
  0x6b   : > { %v2264_v1 = vld [vmem:[#allocation2] sm:$0xff]  ;;  %s1952_s1 = smov 48   ;;  %s2497_s8 = scalar_lea.vmem %s2429_s5, %s2221_s14 }
  0x6c   : > { %v693_v2 = vsel %vm692_vm1, %v2264_v1, 0.0  ;;  %v1668_v4 = vpop.eup %1667  ;;  %s2499_s9 = scalar_lea.vmem [#allocation9], %s2205_s24  ;;  %p1514_p9 = scmp.ne.s32.totalorder %s1923_s27, 1 }
  0x6d   : > { %694 = vadd.xlane.f32.xlu0 %v693_v2  ;;  %v697_v5 = vmul.f32 32.0, %v1668_v4  ;;  %vm701_vm2 = vweird.f32 %v1668_v4 }
  0x6f   : > { %v698_v6 = vsub.f32 1.0, %v697_v5 }
  0x71   : > { %v699_v7 = vmul.f32 %v1668_v4, %v698_v6 }
  0x73   : > { %v700_v8 = vadd.f32 %v1668_v4, %v699_v7 }
  0x75   : > { %v2268_v9 = vsel %vm701_vm2, %v1668_v4, %v700_v8 }
  0xe0   : > { %v695_v10 = vpop.xlane.xlu0 %694 }
  0xe1   : > { %v703_v11 = vmul.f32 %v2268_v9, %v695_v10 }
  0xe3   : > { %v704_v12 = vsub.f32 %v2264_v1, %v703_v11 }
  0xe5   : > { %v705_v13 = vmul.f32 %v704_v12, %v704_v12 }
  0xe7   : > { %v706_v14 = vsel %vm692_vm1, %v705_v13, 0.0 }
  0xe8   : > { %707 = vadd.xlane.f32.xlu0 %v706_v14 }
 0x15b   : > { %v708_v17 = vpop.xlane.xlu0 %707 }
 0x15c   : > { %v709_v18 = vmul.f32 %v708_v17, %v2268_v9 }
 0x15e   : > { %v710_v19 = vadd.f32 1e-05, %v709_v18 }
 0x160   : > { %1669 = vrsqrt.f32 %v710_v19  ;;  %vm717_vm4 = vweird.f32 %v710_v19 }
 0x166   : > { %v1670_v20 = vpop.eup %1669 }
 0x167   : > { %v712_v21 = vmul.f32 %v1670_v20, %v710_v19  ;;  %vm718_vm3 = vweird.f32 %v1670_v20 }
 0x168   : > { %vm719_vm5 = vmor %vm717_vm4, %vm718_vm3 }
 0x169   : > { %v713_v22 = vmul.f32 %v1670_v20, %v712_v21 }
 0x16b   : > { %v714_v23 = vmul.f32 0.5, %v713_v22 }
 0x16d   : > { %v715_v24 = vsub.f32 1.5, %v714_v23 }
 0x16f   : > { %v716_v25 = vmul.f32 %v1670_v20, %v715_v24 }
 0x171   : > { %v720_v27 = vsel %vm719_vm5, %v1670_v20, %v716_v25 }
 0x172   : > { %v721_v28 = vmul.f32 %v720_v27, %v704_v12 }
 0x174   : > { %v725_v30 = vmul.f32 %v1660_v26, %v721_v28 }
 0x176   : > { %v729_v31 = vadd.f32 %v1661_v29, %v725_v30 }
 0x178   : > { %v730_v32 = vpack.c.bf16 %v729_v31, %v729_v31 }
 0x17a   : > { %1475 = vmatmul.msk.bf16.vlgmr.msra.gmra.mxu0 %vm692_vm1, %v730_v32 }
 0x1f7   : > { %v759_v33 = vpop.f32.mrf.mxu0 }
 0x1f8   : > { %v763_v34 = vpack.c.bf16 %v759_v33, %v759_v33 }
 0x1fa   : > { %v765_v35 = vunpack.c.l.b16 %v763_v34 }
 0x1fc   : > { %v2281_v36 = vpack.c.b16 %v765_v35, %v765_v35 }
 0x1fe   : > { %827 = vrot.lane.b32.xlu0 %v2281_v36, %s1942_s25  ;;  %767 = vrot.lane.b32.xlu1 %v2281_v36, %s1943_s29 }
 0x1ff   : > { %v761_v37 = vpop.f32.mrf.mxu0 }
 0x206   : > { %923 = vrot.lane.b32.xlu0 %v2281_v36, %s1944_s26 }
 0x20e   : > { %921 = vrot.lane.b32.xlu0 %v2281_v36, %s1945_s28 }
 0x270   : > { %v828_v38 = vpop.permute.xlu0 %827  ;;  %v768_v39 = vpop.permute.xlu1 %767 }
 0x271   : > { %v774_v40 = vsel %vm769_vm6, %v768_v39, 0  ;;  %v833_v41 = vsel %vm769_vm6, %v828_v38, 0 }
 0x272   : > { %783 = vmatpush.bf16.xpose.msra.mxu1 %v774_v40  ;;  %842 = vmatpush.bf16.xpose.msra.mxu3 %v833_v41 }
 0x278   : > { %v924_v42 = vpop.permute.xlu0 %923 }
 0x279   : > { %1476 = vmatmul.msk.bf16.vlgmr.msra.gmra.mxu1 %vm769_vm6, %v763_v34  ;;  %v929_v43 = vsel %vm769_vm6, %v924_v42, 0 }
 0x27a   : > { %938 = vmatpush.bf16.xpose.msrb.mxu3 %v929_v43  ;;  %915 = vmatpush.bf16.msrb.mxu1 %v906_v53 }
 0x280   : > { %v922_v63 = vpop.permute.xlu0 %921 }
 0x2f6   : > { %v785_v44 = vpop.f32.mrf.mxu1 }
 0x2f7   : > { %v789_v45 = vsel %vm769_vm6, %v785_v44, -inf }
 0x2f8   : > { %790 = vmax.xlane.f32.xlu1 %v789_v45 }
 0x2fe   : > { %v787_v46 = vpop.f32.mrf.mxu1 }
 0x2ff   : > { %v882_v46 = vld [vmem:[%s2236_s30 + $0x4] sm:$0xf] }
 0x36b   : > { %v791_v47 = vpop.xlane.xlu1 %790 }
 0x36c   : > { %v792_v48 = vsub.f32 %v785_v44, %v791_v47  ;;  %v887_v47 = vsel %vm806_vm7, %v882_v46, 0 }
 0x36d   : > { %896 = vmatpush.bf16.msrb.mxu0 %v887_v47  ;;  %v1666_v47 = vld [vmem:[%s680_s0] ss:$0 sm:$0xff] }
 0x36e   : > { %v793_v49 = vmul.f32 1.442695, %v792_v48 }
 0x370   : > { %1671 = vpow2.f32 %v793_v49  ;;  %v978_v49 = vld [vmem:[%s2236_s30 + $0x8] sm:$0xf] }
 0x376   : > { %v1672_v50 = vpop.eup %1671 }
 0x377   : > { %v795_v51 = vsel %vm769_vm6, %v1672_v50, 0.0 }
 0x378   : > { %796 = vadd.xlane.f32.xlu2 %v795_v51 }
 0x390   : > { %801 = vrot.lane.b32.xlu2 %v2281_v36, %s1946_s21 }
 0x398   : > { %825 = vrot.lane.b32.xlu2 %v2281_v36, %s1947_s11 }
 0x3a0   : > { %1001 = vrot.lane.b32.xlu2 %v2281_v36, %s1948_s17 }
 0x3a8   : > { %999 = vrot.lane.b32.xlu2 %v2281_v36, %s1949_s4 }
 0x3eb   : > { %v797_v54 = vpop.xlane.xlu2 %796 }
 0x3ec   : > { %1673 = vrcp.f32 %v797_v54  ;;  %v1056_v54 = vld [vmem:[%s2236_s30 + $0xc] sm:$0xf] }
 0x3f2   : > { %v1674_v55 = vpop.eup %1673 }
 0x3f3   : > { %v802_v56 = vpop.permute.xlu2 %801  ;;  %v799_v57 = vmul.f32 %v1674_v55, %v1672_v50  ;;  %v983_v50 = vsel %vm806_vm7, %v978_v49, 0  ;;  %v1061_v55 = vsel %vm806_vm7, %v1056_v54, 0 }
 0x3f4   : > { %v808_v58 = vsel %vm806_vm7, %v802_v56, 0  ;;  %992 = vmatpush.bf16.msra.mxu0 %v983_v50 }
 0x3f5   : > { %817 = vmatpush.bf16.msra.mxu2 %v808_v58  ;;  %v800_v59 = vpack.c.bf16 %v799_v57, %v799_v57 }
 0x3f8   : > { %1477 = vmatmul.msk.bf16.vlgmr.msra.gmra.mxu2 %vm769_vm6, %v800_v59 }
 0x3fb   : > { %v826_v60 = vpop.permute.xlu2 %825 }
 0x3fc   : > { %1478 = vmatmul.msk.bf16.vlgmr.msra.gmra.mxu3 %vm769_vm6, %v826_v60 }
 0x403   : > { %v1002_v61 = vpop.permute.xlu2 %1001 }
 0x404   : > { %v1007_v62 = vsel %vm769_vm6, %v1002_v61, 0 }
 0x405   : > { %1016 = vmatpush.bf16.xpose.msra.mxu1 %v1007_v62 }
 0x40b   : > { %v1000_v7 = vpop.permute.xlu2 %999 }
 0x40c   : > { %1482 = vmatmul.msk.bf16.vlgmr.msrb.gmra.mxu3 %vm769_vm6, %v922_v63 }
 0x47b   : > { %v819_v0 = vpop.f32.mrf.mxu2 }
 0x47c   : > { %v823_v2 = vpack.c.bf16 %v819_v0, %v819_v0 }
 0x47e   : > { %1481 = vmatmul.msk.bf16.vlgmr.msrb.gmra.mxu1 %vm769_vm6, %v823_v2 }
 0x47f   : > { %v844_v3 = vpop.f32.mrf.mxu3 }
 0x480   : > { %v848_v4 = vsel %vm769_vm6, %v844_v3, -inf }
 0x481   : > { %849 = vmax.xlane.f32.xlu1 %v848_v4 }
 0x483   : > { %v821_v5 = vpop.f32.mrf.mxu2 }
 0x487   : > { %v846_v6 = vpop.f32.mrf.mxu3 }
 0x48e   : > { %1485 = vmatmul.msk.bf16.vlgmr.msra.gmra.mxu1 %vm769_vm6, %v1000_v7 }
 0x48f   : > { %v940_v8 = vpop.f32.mrf.mxu3 }
 0x490   : > { %v944_v10 = vsel %vm769_vm6, %v940_v8, -inf }
 0x491   : > { %945 = vmax.xlane.f32.xlu2 %v944_v10 }
 0x497   : > { %v942_v11 = vpop.f32.mrf.mxu3 }
 0x498   : > { %v1662_v11 = vld [vmem:[%s2497_s8] ss:$0 sm:$0xff] }
 0x4a9   : > { %1034 = vrot.lane.b32.xlu2 %v2281_v36, %s1950_s16 }
 0x4f4   : > { %v850_v12 = vpop.xlane.xlu1 %849 }
 0x4f5   : > { %v851_v13 = vsub.f32 %v844_v3, %v850_v12 }
 0x4f7   : > { %v852_v14 = vmul.f32 1.442695, %v851_v13 }
 0x4f9   : > { %1675 = vpow2.f32 %v852_v14 }
 0x4fb   : > { %v2309_v15 = vpop.f32.mrf.mxu1 }
 0x4ff   : > { %v1676_v16 = vpop.eup %1675 }
 0x500   : > { %v854_v17 = vsel %vm769_vm6, %v1676_v16, 0.0 }
 0x501   : > { %855 = vadd.xlane.f32.xlu1 %v854_v17 }
 0x503   : > { %v919_v18 = vpop.f32.mrf.mxu1 }
 0x504   : > { %v946_v19 = vpop.xlane.xlu2 %945 }
 0x505   : > { %v947_v20 = vsub.f32 %v940_v8, %v946_v19 }
 0x507   : > { %v948_v21 = vmul.f32 1.442695, %v947_v20 }
 0x509   : > { %1677 = vpow2.f32 %v948_v21  ;;  %v1526_v21 = vld [vmem:[%s2245_s7 + $0x8] sm:$0xff] }
 0x50b   : > { %v1018_v22 = vpop.f32.mrf.mxu1 }
 0x50c   : > { %v1035_v23 = vpop.permute.xlu2 %1034  ;;  %v1022_v24 = vsel %vm769_vm6, %v1018_v22, -inf }
 0x50d   : > { %v1040_v25 = vsel %vm806_vm7, %v1035_v23, 0  ;;  %1023 = vmax.xlane.f32.xlu0 %v1022_v24 }
 0x50e   : > { %1049 = vmatpush.bf16.msra.mxu3 %v1040_v25  ;;  %v1529_v25 = vld [vmem:[%s2255_s12 + $0x10] sm:$0xff] }
 0x50f   : > { %v1678_v26 = vpop.eup %1677 }
 0x510   : > { %v950_v28 = vsel %vm769_vm6, %v1678_v26, 0.0 }
 0x513   : > { %v1020_v27 = vpop.f32.mrf.mxu1 }
 0x514   : > { %v1528_v27 = vld [vmem:[%s2255_s12 + $0x8] sm:$0xff] }
 0x515   : > { %951 = vadd.xlane.f32.xlu0 %v950_v28 }
 0x51a   : > { %860 = vrot.lane.b32.xlu1 %v2281_v36, %s1951_s18 }
 0x529   : > { %956 = vrot.lane.b32.xlu0 %v2281_v36, %s1952_s1 }
 0x574   : > { %v856_v29 = vpop.xlane.xlu1 %855 }
 0x575   : > { %1679 = vrcp.f32 %v856_v29 }
 0x57b   : > { %v1680_v33 = vpop.eup %1679 }
 0x57c   : > { %v858_v35 = vmul.f32 %v1680_v33, %v1676_v16 }
 0x57e   : > { %v859_v36 = vpack.c.bf16 %v858_v35, %v858_v35 }
 0x580   : > { %v1024_v30 = vpop.xlane.xlu0 %1023 }
 0x581   : > { %v1025_v31 = vsub.f32 %v1018_v22, %v1024_v30  ;;  %v1525_v22 = vld [vmem:[%s2245_s7] sm:$0xff] }
 0x583   : > { %v1026_v32 = vmul.f32 1.442695, %v1025_v31 }
 0x585   : > { %1681 = vpow2.f32 %v1026_v32 }
 0x588   : > { %v952_v40 = vpop.xlane.xlu0 %951 }
 0x589   : > { %1683 = vrcp.f32 %v952_v40 }
 0x58b   : > { %v1682_v34 = vpop.eup %1681 }
 0x58c   : > { %v861_v37 = vpop.permute.xlu1 %860  ;;  %v1028_v38 = vsel %vm769_vm6, %v1682_v34, 0.0 }
 0x58d   : > { %1029 = vadd.xlane.f32.xlu1 %v1028_v38  ;;  %v866_v39 = vsel %vm806_vm7, %v861_v37, 0  ;;  %v1664_v37 = vld [vmem:[%s2499_s9] ss:$0 sm:$0xff] }
 0x58e   : > { %875 = vmatpush.bf16.msrb.mxu2 %v866_v39 }
 0x58f   : > { %v1684_v41 = vpop.eup %1683 }
 0x590   : > { %v954_v42 = vmul.f32 %v1684_v41, %v1678_v26  ;;  %v1665_v41 = vld [vmem:[%s672_s6] ss:$0 sm:$0xff] }
 0x591   : > { %1479 = vmatmul.msk.bf16.vlgmr.msrb.gmra.mxu2 %vm769_vm6, %v859_v36  ;;  %v1527_v36 = vld [vmem:[%s2255_s12] sm:$0xff] }
 0x592   : > { %v955_v45 = vpack.c.bf16 %v954_v42, %v954_v42 }
 0x59b   : > { %v957_v43 = vpop.permute.xlu0 %956 }
 0x59c   : > { %v962_v44 = vsel %vm806_vm7, %v957_v43, 0 }
 0x59d   : > { %971 = vmatpush.bf16.msra.mxu2 %v962_v44 }
 0x5a1   : > { %1483 = vmatmul.msk.bf16.vlgmr.msra.gmra.mxu2 %vm769_vm6, %v955_v45 }
 0x5a2   : > { %1070 = vmatpush.bf16.msrb.mxu2 %v1061_v55 }
 0x600   : > { %v1030_v48 = vpop.xlane.xlu1 %1029 }
 0x601   : > { %1685 = vrcp.f32 %v1030_v48 }
 0x607   : > { %v1686_v51 = vpop.eup %1685 }
 0x608   : > { %v1032_v52 = vmul.f32 %v1686_v51, %v1682_v34 }
 0x60a   : > { %v1033_v53 = vpack.c.bf16 %v1032_v52, %v1032_v52 }
 0x60c   : > { %1486 = vmatmul.msk.bf16.vlgmr.msra.gmra.mxu3 %vm769_vm6, %v1033_v53 }
 0x614   : > { %v877_v56 = vpop.f32.mrf.mxu2 }
 0x615   : > { %v881_v57 = vpack.c.bf16 %v877_v56, %v877_v56 }
 0x617   : > { %1480 = vmatmul.msk.bf16.vlgmr.msrb.gmra.mxu0 %vm769_vm6, %v881_v57 }
 0x618   : > { %1145 = vmatpush.bf16.msrb.mxu0 %v1526_v21 }
 0x61c   : > { %v879_v58 = vpop.f32.mrf.mxu2  ;;  %1146 = vmatpush.bf16.msrb.mxu0 %v1525_v22 }
 0x624   : > { %v973_v59 = vpop.f32.mrf.mxu2 }
 0x625   : > { %v977_v60 = vpack.c.bf16 %v973_v59, %v973_v59 }
 0x627   : > { %1484 = vmatmul.msk.bf16.vlgmr.msra.gmra.mxu0 %vm769_vm6, %v977_v60 }
 0x62c   : > { %v975_v61 = vpop.f32.mrf.mxu2 }
 0x68f   : > { %v1051_v62 = vpop.f32.mrf.mxu3 }
 0x690   : > { %v1055_v63 = vpack.c.bf16 %v1051_v62, %v1051_v62 }
 0x692   : > { %1487 = vmatmul.msk.bf16.vlgmr.msrb.gmra.mxu2 %vm769_vm6, %v1055_v63 }
 0x694   : > { %v898_v0 = vpop.f32.mrf.mxu0 }
 0x695   : > { %v918_v4 = vadd.f32 %v2309_v15, %v898_v0 }
 0x697   : > { %v1053_v2 = vpop.f32.mrf.mxu3 }
 0x69c   : > { %v900_v3 = vpop.f32.mrf.mxu0 }
 0x6a4   : > { %v994_v5 = vpop.f32.mrf.mxu0 }
 0x6a5   : > { %v998_v6 = vadd.f32 %v994_v5, %v918_v4 }
 0x6ac   : > { %v996_v7 = vpop.f32.mrf.mxu0 }
 0x715   : > { %v1072_v8 = vpop.f32.mrf.mxu2 }
 0x716   : > { %v1076_v10 = vadd.f32 %v1072_v8, %v998_v6 }
 0x718   : > { %v1077_v12 = vadd.f32 %v1076_v10, %v2264_v1  ;;  %v1530_v1 = vld [vmem:[%s2255_s12 + $0x18] sm:$0xff] }
 0x719   : > { %1198 = vmatpush.bf16.msrb.mxu1 %v1530_v1 }
 0x71a   : > { %v1082_v13 = vadd.f32 %v1662_v11, %v1077_v12 }
 0x71c   : > { %v1085_v14 = vsel %vm692_vm1, %v1082_v13, 0.0 }
 0x71d   : > { %v1074_v16 = vpop.f32.mrf.mxu2  ;;  %1086 = vadd.xlane.f32.xlu2 %v1085_v14  ;;  %1199 = vmatpush.bf16.msrb.mxu1 %v1529_v25 }
 0x721   : > { %1200 = vmatpush.bf16.msrb.mxu1 %v1528_v27 }
 0x725   : > { %1201 = vmatpush.bf16.msrb.mxu1 %v1527_v36 }
 0x790   : > { %v1087_v15 = vpop.xlane.xlu2 %1086 }
 0x791   : > { %v1088_v17 = vmul.f32 %v1087_v15, %v2268_v9 }
 0x793   : > { %v1089_v18 = vsub.f32 %v1082_v13, %v1088_v17 }
 0x795   : > { %v1090_v19 = vmul.f32 %v1089_v18, %v1089_v18 }
 0x797   : > { %v1091_v20 = vsel %vm692_vm1, %v1090_v19, 0.0 }
 0x798   : > { %1092 = vadd.xlane.f32.xlu0 %v1091_v20 }
 0x80b   : > { %v1093_v23 = vpop.xlane.xlu0 %1092 }
 0x80c   : > { %v1094_v24 = vmul.f32 %v1093_v23, %v2268_v9  ;;  %v1663_v9 = vld [vmem:[%s664_s10] ss:$0 sm:$0xff] }
 0x80e   : > { %v1095_v26 = vadd.f32 1e-05, %v1094_v24 }
 0x810   : > { %1687 = vrsqrt.f32 %v1095_v26  ;;  %vm1102_vm9 = vweird.f32 %v1095_v26 }
 0x816   : > { %v1688_v28 = vpop.eup %1687 }
 0x817   : > { %v1097_v29 = vmul.f32 %v1688_v28, %v1095_v26  ;;  %vm1103_vm8 = vweird.f32 %v1688_v28 }
 0x818   : > { %vm1104_vm10 = vmor %vm1102_vm9, %vm1103_vm8 }
 0x819   : > { %v1098_v30 = vmul.f32 %v1688_v28, %v1097_v29 }
 0x81b   : > { %v1099_v31 = vmul.f32 0.5, %v1098_v30 }
 0x81d   : > { %v1100_v32 = vsub.f32 1.5, %v1099_v31 }
 0x81f   : > { %v1101_v33 = vmul.f32 %v1688_v28, %v1100_v32 }
 0x821   : > { %v1105_v34 = vsel %vm1104_vm10, %v1688_v28, %v1101_v33 }
 0x822   : > { %v1106_v35 = vmul.f32 %v1105_v34, %v1089_v18 }
 0x824   : > { %v1110_v38 = vmul.f32 %v1663_v9, %v1106_v35 }
 0x826   : > { %v1114_v39 = vadd.f32 %v1664_v37, %v1110_v38 }
 0x828   : > { %v1115_v40 = vpack.c.bf16 %v1114_v39, %v1114_v39 }
 0x82a   : > { %1496 = vmatmul.msk.bf16.vlgmr.msrb.gmra.mxu0 %vm692_vm1, %v1115_v40 }
 0x8a7   : > { %v1148_v42 = vpop.f32.mrf.mxu0 }
 0x8a8   : > { %v1149_v43 = vadd.f32 %v1665_v41, %v1148_v42 }
 0x8aa   : > { %v1152_v44 = vmax.f32 %v1149_v43, 0.0 }
 0x8ac   : > { %v1153_v45 = vpack.c.bf16 %v1152_v44, %v1152_v44 }
 0x8ae   : > { %1513 = vmatmul.msk.bf16.vlgmr.msrb.gmra.mxu1 %vm1190_vm11, %v1153_v45 }
 0x8af   : > { %v1150_v46 = vpop.f32.mrf.mxu0 }
 0x92b   : > { %v1203_v48 = vpop.f32.mrf.mxu1 }
 0x92c   : > { %v1204_v49 = vadd.f32 %v1666_v47, %v1203_v48 }
 0x92e   : > { %v1207_v50 = vadd.f32 %v1204_v49, %v1082_v13 }
 0x92f   : > { %1212 = sbr.rel (%p1514_p9) target bundleno = 2357 (0x935), region = 92 }
 0x930   : > { %1208 = vst.msk [vmem:[#allocation2] sm:$0xff] %vm692_vm1, %v1207_v50 }
 0x933   : > { %v1205_v51 = vpop.f32.mrf.mxu1 }
 0x934   : > { %1213 = vst.msk [vmem:[%s2261_s20] sm:$0xff] %vm692_vm1, %v1207_v50 }
 0x935 PF: > { %s2502_s6 = sld [smem:[#allocation21_spill]]  ;;  %s1227_s17 = sshll.u32 %s2261_s20, 4  ;;  %s1228_s17 = int_to_ptr.vmem [resolvable:$true] %s1227_s17 }
 0x936   : > { %s2504_s28 = sld [smem:[#allocation41_spill]]  ;;  %s1215_s16 = scalar_lea.sflag [#allocation5], %s2195_s23 }
 0x93b   : > { %s1516_s26 = sshll.u32 %s2502_s6, 3 }
 0x93c   : > { %s2505_s11 = smov %s2504_s28  ;;  %s1225_s21 = scalar_lea.hbm %s2504_s28, %s1516_s26 }
 0x93d   : > { %s1229_s4 = sshll.u32 %s1225_s21, 4  ;;  %s1829_s3 = scalar_lea.hbm %s2505_s11, 16  ;;  %s1230_s4 = int_to_ptr.hbm [resolvable:$true] %s1229_s4 }
 0x93e   : > { %s1823_s27 = sshra.s32 %s1230_s4, 4  ;;  %s1824_s27 = int_to_ptr.hbm [resolvable:$true] %s1823_s27 }
 0x93f   : > { %s1825_s18 = scalar_lea.hbm %s1824_s27, 8  ;;  %p1830_p5 = scmp.lt.s32.totalorder %s1824_s27, %s2505_s11 }
 0x940   : > { %p1826_p12 = scmp.ne.s32.totalorder %s1824_s27, %s1825_s18  ;;  %p1831_p6 = scmp.lt.s32.totalorder %s1829_s3, %s1825_s18 }
 0x942   : > { %p1827_p13 = pnand %p1826_p12, %p2154_p0  ;;  %p1832_p10 = por %p1831_p6, %p1830_p5 }
 0x944   : > { %p1828_p4 = pneg %p1827_p13 }
 0x946   : > { %p1833_p1 = pnand %p1832_p10, %p1828_p4 }
 0x948   : > { %1836 = shalt.err (!%p1833_p1)
}
 0x949   : > { %1539 = dma.vmem_to_hbm [thread:$0]  (%p2154_p0), %s1228_s17, 128, %s1230_s4, %s1215_s16  }
 0x94a PF: > { %s2506_s23 = sld [smem:[#allocation18_spill]]  ;;  %p1559_p11 = scmp.ge.s32.totalorder %s1939_s13, 2 }
 0x94c   : > { %p1555_p2 = pnand %p1559_p11, %p2161_p3 }
 0x94e   : > { %p1556_p8 = pneg %p1555_p2 }
 0x950   : > { %s1241_s19 = sand.u32 1, %s2506_s23  }
 0x951   : > { %s1242_s15 = scalar_lea.sflag [#allocation5], %s1241_s19 }
 0x952   : > { %1894 = dma.done.wait (%p1556_p8), %s1242_s15, 128  }
 0x953   : > { %1896 = vsyncadd (%p1556_p8), %s1242_s15, 4294967168  ;;  %s34_s13 = sadd.s32 1, %s1939_s13   ;;  %s2508_s21 = sld [smem:[#allocation16_spill]] }
 0x954   : > { %p31_p7 = scmp.ge.s32.totalorder %s34_s13, 6   ;;  %s2509_s22 = sld [smem:[#allocation17_spill]] }
 0x955   : > { %s2510_s23 = sld [smem:[#allocation25_spill]] }
 0x956   : > { %s2511_s24 = sld [smem:[#allocation19_spill]] }
 0x957   : > { %s2512_s25 = sld [smem:[#allocation20_spill]] }
 0x958   : > { %s2513_s26 = sld [smem:[#allocation29_spill]]  ;;  %33 = sbr.rel (!%p31_p7) target bundleno = 26 (0x1a), region = 182 }
 0x959   : > { %s2514_s27 = sld [smem:[#allocation22_spill]] }
 0x95a   : > { %s2515_s28 = sld [smem:[#allocation23_spill]] }
 0x95b   : > { %s2516_s29 = sld [smem:[#allocation24_spill]] }
 0x95c   : > { %s2517_s30 = sld [smem:[#allocation26_spill]] }
 0x95d   :  { %1248 = vsyncpa [#allocation4], 1 }
 0x95e   :  { %1250 = vsyncpa [#allocation4 + $0x1], 1 }
 0x95f   :  { %1251 = vsyncpa [#allocation7], 1 }
 0x960   :  { %1253 = vsyncpa [#allocation7 + $0x1], 1 }
 0x961   :  { %1254 = vsyncpa [#allocation10], 1 }
 0x962   :  { %1256 = vsyncpa [#allocation10 + $0x1], 1 }
 0x963   :  { %1257 = vsyncpa [#allocation5], 1 }
 0x964   :  { %1259 = vsyncpa [#allocation5 + $0x1], 1 }

</bundles_post_ra>
